<compile_context>
chip_gen: v7x
topology: tpu7x:2x2x1
jax: 0.10.0
libtpu: 0.0.40
codegen_flags: <defaults>
</compile_context>

<pallas_src>
import functools

import jax
import jax.numpy as jnp
from jax.experimental import pallas as pl
from jax.experimental.pallas import tpu as pltpu


def _split_mse_kernel(x_ref, xh_ref, sums_ref, acc_ref, *,
                      split, batch, tile_b, acc_rows, feat):
    """Stream one (tile_b, feat) batch tile into a resident (acc_rows, feat) column accumulator."""
    i = pl.program_id(0)
    last = pl.num_programs(0) - 1

    @pl.when(i == 0)
    def _init():
        acc_ref[...] = jnp.zeros_like(acc_ref)

    diff = xh_ref[...].astype(jnp.float32) - x_ref[...].astype(jnp.float32)
    sq = diff * diff

    def _accumulate(vals):
        if acc_rows == 1:
            acc_ref[...] += vals.sum(axis=0, keepdims=True)
        else:
            # Layout-preserving split of the sublane axis, then a pure leading-axis
            # (VPU) reduce — no per-tile cross-lane/XLU reduction.
            acc_ref[...] += vals.reshape(tile_b // acc_rows, acc_rows, feat).sum(axis=0)

    if batch % tile_b != 0:
        # Only the final tile contains padded/undefined rows; pay the mask there only.
        @pl.when(i != last)
        def _full_tile():
            _accumulate(sq)

        @pl.when(i == last)
        def _ragged_tile():
            row = jax.lax.broadcasted_iota(jnp.int32, sq.shape, 0)
            valid_rows = batch - i * tile_b
            _accumulate(jnp.where(row < valid_rows, sq, 0.0))
    else:
        _accumulate(sq)

    @pl.when(i == last)
    def _finalize():
        acc = acc_ref[...]  # (acc_rows, feat) f32
        # `split` is a static Python int -> the column mask is constant-folded.
        col = jax.lax.broadcasted_iota(jnp.int32, acc.shape, 1)
        sums_ref[0] = jnp.sum(jnp.where(col < split, acc, 0.0))   # cartesian sum-of-squares
        sums_ref[1] = jnp.sum(jnp.where(col >= split, acc, 0.0))  # dihedral  sum-of-squares


def _sublane_pack(itemsize: int) -> int:
    # Native second-to-last-dim packing: 8 for 4-byte, 16 for 2-byte, 32 for 1-byte dtypes.
    if itemsize in (1, 2, 4):
        return 32 // itemsize
    return 8


def _pick_batch_tile(batch: int, bytes_per_row_pair: int, pack: int) -> int:
    """Pick the batch tile: big (amortize per-step overhead), packing-aligned, divisor of B if possible."""
    budget_bytes = 32 * 1024 * 1024          # double-buffered working set across both inputs
    max_tb = budget_bytes // (2 * bytes_per_row_pair)   # 2 pipeline buffers per input
    if max_tb >= batch:
        return batch                          # single block == full array dims (always legal)
    max_tb = max(pack, (max_tb // pack) * pack)
    # Prefer an exact divisor of batch near the budget tile so no ragged masking is needed.
    tb = max_tb
    floor = max(pack, (max_tb * 3) // 4)
    while tb >= floor:
        if batch % tb == 0:
            return tb
        tb -= pack
    return max_tb


def xyz_dihedral_aae_generator_loss(x: jax.Array, x_hat: jax.Array, split: int,
                                    *, tile_b: int | None = None) -> dict:
    """Equivalent of XYZDihderalAAEGeneratorLoss().forward(x, x_hat, split) with mse/mse/kl=False."""
    B, D = x.shape
    assert x_hat.shape == (B, D)
    assert 0 < split < D

    x_item = jnp.dtype(x.dtype).itemsize
    xh_item = jnp.dtype(x_hat.dtype).itemsize
    pack = max(_sublane_pack(x_item), _sublane_pack(xh_item))

    if tile_b is None:
        tile_b = _pick_batch_tile(B, D * (x_item + xh_item), pack)
    tile_b = min(int(tile_b), B)
    grid_b = pl.cdiv(B, tile_b)

    acc_rows = 8 if tile_b % 8 == 0 else 1

    kernel = functools.partial(
        _split_mse_kernel,
        split=int(split), batch=B, tile_b=tile_b, acc_rows=acc_rows, feat=D)

    sums = pl.pallas_call(
        kernel,
        out_shape=jax.ShapeDtypeStruct((2,), jnp.float32),
        grid_spec=pltpu.PrefetchScalarGridSpec(
            num_scalar_prefetch=0,
            grid=(grid_b,),
            in_specs=[
                pl.BlockSpec((tile_b, D), lambda i: (i, 0)),
                pl.BlockSpec((tile_b, D), lambda i: (i, 0)),
            ],
            out_specs=pl.BlockSpec(memory_space=pltpu.MemorySpace.SMEM),
            scratch_shapes=[pltpu.VMEM((acc_rows, D), jnp.float32)],
        ),
        compiler_params=pltpu.CompilerParams(
            # Resident accumulator across the (reduction) grid axis.
            dimension_semantics=("arbitrary",),
            vmem_limit_bytes=48 * 1024 * 1024,
        ),
        cost_estimate=pl.CostEstimate(
            flops=3 * B * D,
            transcendentals=0,
            bytes_accessed=B * D * (x_item + xh_item) + 8,
        ),
    )(x, x_hat)

    cart_loss = sums[0] / jnp.float32(B * split)
    dih_loss = sums[1] / jnp.float32(B * (D - split))
    total = cart_loss + dih_loss
    return {
        "loss": total,
        "Reconstruction_Loss": cart_loss,
        "Dihdedral_loss": dih_loss,
    }


def _reference(x, x_hat, split):
    xf = x.astype(jnp.float32)
    xhf = x_hat.astype(jnp.float32)
    cart = jnp.mean((xhf[:, :split] - xf[:, :split]) ** 2)
    dih = jnp.mean((xhf[:, split:] - xf[:, split:]) ** 2)
    return cart, dih


def _check(report, x, x_hat, split):
    cart_ref, dih_ref = _reference(x, x_hat, split)
    assert jnp.allclose(report["Reconstruction_Loss"], cart_ref, rtol=1e-5, atol=1e-5)
    assert jnp.allclose(report["Dihdedral_loss"], dih_ref, rtol=1e-5, atol=1e-5)
    assert jnp.allclose(report["loss"], cart_ref + dih_ref, rtol=1e-5, atol=1e-5)


if __name__ == "__main__":
    key = jax.random.PRNGKey(0)

    # --- Case 1: small, single block, f32 ---
    k1, k2 = jax.random.split(key)
    B, D, split = 8, 128, 48
    x = jax.random.normal(k1, (B, D), dtype=jnp.float32)
    x_hat = jax.random.normal(k2, (B, D), dtype=jnp.float32)
    report = xyz_dihedral_aae_generator_loss(x, x_hat, split)
    jax.block_until_ready(report["loss"])
    _check(report, x, x_hat, split)

    # --- Case 2: ragged batch tiling (last-tile row mask), bf16 inputs, multi-tile ---
    k3, k4 = jax.random.split(k2)
    B2, D2, split2 = 20, 256, 96
    x2 = jax.random.normal(k3, (B2, D2), dtype=jnp.bfloat16)
    x2_hat = jax.random.normal(k4, (B2, D2), dtype=jnp.bfloat16)
    report2 = xyz_dihedral_aae_generator_loss(x2, x2_hat, split2, tile_b=16)  # 20 % 16 != 0
    jax.block_until_ready(report2["loss"])
    _check(report2, x2, x2_hat, split2)

    # --- Case 3: evenly tiled multi-step grid, f32 ---
    k5, k6 = jax.random.split(k4)
    B3, D3, split3 = 512, 192, 60
    x3 = jax.random.normal(k5, (B3, D3), dtype=jnp.float32)
    x3_hat = jax.random.normal(k6, (B3, D3), dtype=jnp.float32)
    report3 = xyz_dihedral_aae_generator_loss(x3, x3_hat, split3, tile_b=128)
    jax.block_until_ready(report3["loss"])
    _check(report3, x3, x3_hat, split3)

    print("KERNEL_OK")
</pallas_src>

<mosaic_0001>
module attributes {stable_mosaic.version = 11 : i64} {
  func.func @_split_mse_kernel(%arg0: i32, %arg1: memref<8x128xf32, #tpu.memory_space<vmem>>, %arg2: memref<8x128xf32, #tpu.memory_space<vmem>>, %arg3: memref<2xf32, #tpu.memory_space<smem>>, %arg4: memref<8x128xf32, #tpu.memory_space<vmem>>) attributes {dimension_semantics = [#tpu.dimension_semantics<arbitrary>], iteration_bounds = array<i64: 1>, scalar_prefetch = 0 : i64, scratch_operands = 1 : i64, tpu.core_type = #tpu.core_type<tc>, window_params = [{transform_indices = @transform_0, window_bounds = array<i64: 8, 128>}, {transform_indices = @transform_1, window_bounds = array<i64: 8, 128>}, {transform_indices = @transform_2, window_bounds = array<i64: 2>}]} {
    %c0_i32 = arith.constant 0 : i32
    %0 = arith.cmpi eq, %arg0, %c0_i32 : i32
    %1 = arith.extui %0 : i1 to i32
    %c0_i32_0 = arith.constant 0 : i32
    %2 = arith.cmpi ne, %1, %c0_i32_0 : i32
    scf.if %2 {
      %cst_10 = arith.constant 0.000000e+00 : f32
      %15 = vector.broadcast %cst_10 : f32 to vector<8x128xf32>
      %c0_11 = arith.constant 0 : index
      %c0_12 = arith.constant 0 : index
      %16 = vector.load %arg4[%c0_11, %c0_12] : memref<8x128xf32, #tpu.memory_space<vmem>>, vector<8x128xf32>
      tpu.vector_store %arg4[%c0_11, %c0_12], %15 {strides = array<i32>} : memref<8x128xf32, #tpu.memory_space<vmem>>, vector<8x128xf32>,
    } else {
    }
    %c0 = arith.constant 0 : index
    %c0_1 = arith.constant 0 : index
    %3 = vector.load %arg2[%c0, %c0_1] : memref<8x128xf32, #tpu.memory_space<vmem>>, vector<8x128xf32>
    %c0_2 = arith.constant 0 : index
    %c0_3 = arith.constant 0 : index
    %4 = vector.load %arg1[%c0_2, %c0_3] : memref<8x128xf32, #tpu.memory_space<vmem>>, vector<8x128xf32>
    %5 = arith.subf %3, %4 : vector<8x128xf32>
    %6 = arith.mulf %5, %5 : vector<8x128xf32>
    %c0_4 = arith.constant 0 : index
    %c0_5 = arith.constant 0 : index
    %7 = vector.load %arg4[%c0_4, %c0_5] : memref<8x128xf32, #tpu.memory_space<vmem>>, vector<8x128xf32>
    %8 = vector.shape_cast %6 : vector<8x128xf32> to vector<1x8x128xf32>
    %cst = arith.constant dense<0.000000e+00> : vector<8x128xf32>
    %9 = vector.multi_reduction <add>, %8, %cst [0] : vector<1x8x128xf32> to vector<8x128xf32>
    %10 = arith.addf %7, %9 : vector<8x128xf32>
    %c0_6 = arith.constant 0 : index
    %c0_7 = arith.constant 0 : index
    %11 = vector.load %arg4[%c0_6, %c0_7] : memref<8x128xf32, #tpu.memory_space<vmem>>, vector<8x128xf32>
    tpu.vector_store %arg4[%c0_6, %c0_7], %10 {strides = array<i32>} : memref<8x128xf32, #tpu.memory_space<vmem>>, vector<8x128xf32>,
    %c0_i32_8 = arith.constant 0 : i32
    %12 = arith.cmpi eq, %arg0, %c0_i32_8 : i32
    %13 = arith.extui %12 : i1 to i32
    %c0_i32_9 = arith.constant 0 : i32
    %14 = arith.cmpi ne, %13, %c0_i32_9 : i32
    scf.if %14 {
      %c0_10 = arith.constant 0 : index
      %c0_11 = arith.constant 0 : index
      %15 = vector.load %arg4[%c0_10, %c0_11] : memref<8x128xf32, #tpu.memory_space<vmem>>, vector<8x128xf32>
      %16 = tpu.iota {dimensions = array<i32: 1>} : vector<8x128xi32>
      %c48_i32 = arith.constant 48 : i32
      %17 = vector.broadcast %c48_i32 : i32 to vector<8x128xi32>
      %18 = arith.cmpi slt, %16, %17 : vector<8x128xi32>
      %cst_12 = arith.constant 0.000000e+00 : f32
      %19 = vector.broadcast %cst_12 : f32 to vector<8x128xf32>
      %20 = arith.select %18, %15, %19 : vector<8x128xi1>, vector<8x128xf32>
      %21 = vector.shape_cast %20 : vector<8x128xf32> to vector<1x8x128xf32>
      %cst_13 = arith.constant dense<0.000000e+00> : vector<1xf32>
      %22 = vector.multi_reduction <add>, %21, %cst_13 [1, 2] : vector<1x8x128xf32> to vector<1xf32>
      %23 = vector.shape_cast %22 : vector<1xf32> to vector<1x1x1xf32>
      %24 = vector.extract %23[0, 0, 0] : f32 from vector<1x1x1xf32>
      %c0_14 = arith.constant 0 : index
      %25 = memref.load %arg3[%c0_14] : memref<2xf32, #tpu.memory_space<smem>>
      memref.store %24, %arg3[%c0_14] : memref<2xf32, #tpu.memory_space<smem>>
      %c48_i32_15 = arith.constant 48 : i32
      %26 = vector.broadcast %c48_i32_15 : i32 to vector<8x128xi32>
      %27 = arith.cmpi sge, %16, %26 : vector<8x128xi32>
      %cst_16 = arith.constant 0.000000e+00 : f32
      %28 = vector.broadcast %cst_16 : f32 to vector<8x128xf32>
      %29 = arith.select %27, %15, %28 : vector<8x128xi1>, vector<8x128xf32>
      %30 = vector.shape_cast %29 : vector<8x128xf32> to vector<1x8x128xf32>
      %cst_17 = arith.constant dense<0.000000e+00> : vector<1xf32>
      %31 = vector.multi_reduction <add>, %30, %cst_17 [1, 2] : vector<1x8x128xf32> to vector<1xf32>
      %32 = vector.shape_cast %31 : vector<1xf32> to vector<1x1x1xf32>
      %33 = vector.extract %32[0, 0, 0] : f32 from vector<1x1x1xf32>
      %c1 = arith.constant 1 : index
      %34 = memref.load %arg3[%c1] : memref<2xf32, #tpu.memory_space<smem>>
      memref.store %33, %arg3[%c1] : memref<2xf32, #tpu.memory_space<smem>>
    } else {
    }
    return
  }
  func.func @transform_0(%arg0: i32) -> (i32, i32) {
    %c0_i32 = arith.constant 0 : i32
    %c0_i32_0 = arith.constant 0 : i32
    return %arg0, %c0_i32 : i32, i32
  }
  func.func @transform_1(%arg0: i32) -> (i32, i32) {
    %c0_i32 = arith.constant 0 : i32
    %c0_i32_0 = arith.constant 0 : i32
    return %arg0, %c0_i32 : i32, i32
  }
  func.func @transform_2(%arg0: i32) -> i32 {
    %c0_i32 = arith.constant 0 : i32
    %c0_i32_0 = arith.constant 0 : i32
    return %c0_i32 : i32
  }
}

</mosaic_0001>

<bundles_post_ra>
// kernel: tpu_custom_call.1
= control target key start
LH: loop header
LB: loop body
LE: loop exit
PB: predicated region body
PF: predicated region fallthrough
CT: control target
= control target key end

     0   :  { %7 = vsyncpa [#allocation4], 0  ;;  %s217_s0 = inlined_call_operand.hbm [shape: f32[8,128], index: 0, kind: input, shape index: {}]   ;;  %s218_s1 = inlined_call_operand.hbm [shape: f32[8,128], index: 1, kind: input, shape index: {}]   ;;  %s219_s2 = inlined_call_operand.hbm [shape: f32[2], index: 2, kind: output, shape index: {}]  }
   0x1   :  { %8 = vsyncpa [#allocation7], 0 }
   0x2   :  { %9 = vsyncpa [#allocation5], 0  ;;  %s163_s9 = smov [#allocation3]   ;;  %s164_s11 = smov [#allocation6]  }
   0x3   :  { %s16_s10 = sshll.u32 %s163_s9, 4  ;;  %s26_s12 = sshll.u32 %s164_s11, 4  ;;  %s17_s10 = int_to_ptr.vmem [resolvable:$true] %s16_s10  ;;  %s27_s12 = int_to_ptr.vmem [resolvable:$true] %s26_s12 }
   0x4   :  { %s103_s15 = scalar_lea.hbm %s217_s0, 128 }
   0x5   :  { %p104_p0 = scmp.ne.s32.totalorder %s217_s0, %s103_s15  ;;  %p107_p1 = scmp.lt.u32.totalorder %s103_s15, %s217_s0 }
   0x7   :  { %p109_p2 = pnand %p107_p1, %p104_p0 }
   0x9   :  { %112 = shalt.err (!%p109_p2)
}
   0xa   :  { %s113_s20 = scalar_lea.vmem %s17_s10, 128  ;;  %p118_p4 = scmp.lt.s32.totalorder %s17_s10, %s17_s10 }
   0xb   :  { %p114_p3 = scmp.ne.s32.totalorder %s17_s10, %s113_s20  ;;  %p119_p5 = scmp.lt.s32.totalorder %s113_s20, %s113_s20 }
   0xd   :  { %p120_p6 = por %p119_p5, %p118_p4 }
   0xf   :  { %p121_p7 = pnand %p120_p6, %p114_p3 }
  0x11   :  { %124 = shalt.err (!%p121_p7)
}
  0x12   :  { %19 = dma.hbm_to_vmem [thread:$0]  %s217_s0, 128, %s17_s10, [#allocation4]  }
  0x13   :  { %s125_s25 = scalar_lea.hbm %s218_s1, 128 }
  0x14   :  { %p126_p8 = scmp.ne.s32.totalorder %s218_s1, %s125_s25  ;;  %p129_p9 = scmp.lt.u32.totalorder %s125_s25, %s218_s1 }
  0x16   :  { %p131_p10 = pnand %p129_p9, %p126_p8 }
  0x18   :  { %134 = shalt.err (!%p131_p10)
}
  0x19   :  { %s135_s30 = scalar_lea.vmem %s27_s12, 128  ;;  %p140_p12 = scmp.lt.s32.totalorder %s27_s12, %s27_s12 }
  0x1a   :  { %p136_p11 = scmp.ne.s32.totalorder %s27_s12, %s135_s30  ;;  %p141_p13 = scmp.lt.s32.totalorder %s135_s30, %s135_s30 }
  0x1c   :  { %p142_p0 = por %p141_p13, %p140_p12 }
  0x1e   :  { %p143_p1 = pnand %p142_p0, %p136_p11 }
  0x20   :  { %146 = shalt.err (!%p143_p1)
}
  0x21   :  { %29 = dma.hbm_to_vmem [thread:$0]  %s218_s1, 128, %s27_s12, [#allocation7]  }
  0x22   :  { %157 = dma.done.wait [#allocation4], 128  }
  0x23   :  { %158 = vsyncadd [#allocation4], 4294967168 }
  0x24   :  { %159 = dma.done.wait [#allocation7], 128  }
  0x25   :  { %160 = vsyncadd [#allocation7], 4294967168  ;;  %v53_v0 = vlaneseq  ;;  %v41_v2 = vld [vmem:[#allocation6] sm:$0xff]  ;;  %v42_v3 = vld [vmem:[#allocation3] sm:$0xff]  ;;  %s147_s7 = scalar_lea.hbm %s219_s2, 16 }
  0x26   :  { %v43_v4 = vsub.f32 %v41_v2, %v42_v3  ;;  %p148_p2 = scmp.ne.s32.totalorder %s219_s2, %s147_s7  ;;  %p151_p3 = scmp.lt.u32.totalorder %s147_s7, %s219_s2 }
  0x27   :  { %v54_v1 = vand.u32 127, %v53_v0 }
  0x28   :  { %v44_v5 = vmul.f32 %v43_v4, %v43_v4  ;;  %p153_p4 = pnand %p151_p3, %p148_p2 }
  0x29   :  { %vm55_vm0 = vcmp.lt.s32.totalorder %v54_v1, 48  ;;  %vm68_vm1 = vcmp.ge.s32.totalorder %v54_v1, 48 }
  0x2a   :  { %v56_v6 = vsel %vm55_vm0, %v44_v5, 0.0  ;;  %v69_v7 = vsel %vm68_vm1, %v44_v5, 0.0 }
  0x2b   :  { %57 = vadd.xlane.f32.xlu0 %v56_v6 }
  0x2f   :  { %70 = vadd.xlane.f32.xlu0 %v69_v7 }
  0xb8   :  { %v58_v8 = vpop.xlane.xlu0 %57 }
  0xb9   :  { %v59_v9 = vrot.slane %v58_v8, 4 }
  0xbb   :  { %v60_v10 = vadd.f32 %v59_v9, %v58_v8 }
  0xbc   :  { %v71_v11 = vpop.xlane.xlu0 %70 }
  0xbd   :  { %v61_v12 = vrot.slane %v60_v10, 2  ;;  %v72_v13 = vrot.slane %v71_v11, 4 }
  0xbf   :  { %v73_v14 = vadd.f32 %v72_v13, %v71_v11  ;;  %v62_v15 = vadd.f32 %v61_v12, %v60_v10 }
  0xc1   :  { %v74_v16 = vrot.slane %v73_v14, 2  ;;  %v63_v17 = vrot.slane %v62_v15, 1 }
  0xc3   :  { %v75_v18 = vadd.f32 %v74_v16, %v73_v14  ;;  %v64_v19 = vadd.f32 %v63_v17, %v62_v15 }
  0xc5   :  { %96 = vpush %v64_v19  ;;  %v76_v20 = vrot.slane %v75_v18, 1 }
  0xc7   :  { %v77_v21 = vadd.f32 %v76_v20, %v75_v18 }
  0xc9   :  { %98 = vpush %v77_v21 }
  0xf6   :  { %s97_s1 = spop %96 }
  0xf7   :  { %67 = sst [smem:[#allocation8]] %s97_s1 }
  0xfa   :  { %s99_s4 = spop %98 }
  0xfb   :  { %80 = sst [smem:[#allocation8 + $0x1]] %s99_s4 }
  0xfc   :  { %156 = shalt.err (!%p153_p4)
}
  0xfd   :  { %s165_s12 = smov [#allocation8]  }
  0xfe   :  { %88 = dma.smem_to_hbm %s165_s12, 16, %s219_s2, [#allocation5]  }
  0xff   :  { %161 = dma.done.wait [#allocation5], 16  }
 0x100   :  { %162 = vsyncadd [#allocation5], 4294967280 }
 0x101   :  { %92 = sfence }
 0x102   :  { %93 = vsyncpa [#allocation4], 1 }
 0x103   :  { %94 = vsyncpa [#allocation7], 1 }
 0x104   :  { %95 = vsyncpa [#allocation5], 1 }

</bundles_post_ra>
